<compile_context>
chip_gen: v7x
topology: tpu7x:2x2x1
jax: 0.10.0
libtpu: 0.0.40
codegen_flags: <defaults>
</compile_context>

<pallas_src>
import functools

import jax
import jax.numpy as jnp
from jax.experimental import pallas as pl
from jax.experimental.pallas import tpu as pltpu


def adaptor_kernel(x_ref, w1_ref, b1_ref, w2_ref, b2_ref, o_ref):
    """One grid step: one batch element x one L-tile, fully fused in VMEM.

    x_ref  : (1, C_in, TL)   compute dtype (bf16 by default)
    w1_ref : (P, C_in)       first 1x1-conv weight
    b1_ref : (P, 1)          first 1x1-conv bias (column -> broadcasts over lanes)
    w2_ref : (P, P)          second 1x1-conv weight
    b2_ref : (P, 1)
    o_ref  : (1, P, TL)      output dtype (matches input x dtype)
    """
    x = x_ref[0]                                            # (C_in, TL)

    # conv1 (k=1): h = W1 @ x + b1, ReLU.  Single MXU matmul, f32 accumulation.
    h = jax.lax.dot_general(w1_ref[...], x, (((1,), (0,)), ((), ())),
                            preferred_element_type=jnp.float32)
    h = jnp.maximum(h + b1_ref[...], 0.0)                   # (P, TL), f32

    # conv2 (k=1): y = W2 @ h + b2, ReLU.  (Small K=P; ~2% of FLOPs, leave as-is.)
    y = jax.lax.dot_general(w2_ref[...], h.astype(w2_ref.dtype),
                            (((1,), (0,)), ((), ())),
                            preferred_element_type=jnp.float32)
    y = jnp.maximum(y + b2_ref[...], 0.0)                   # (P, TL), f32

    o_ref[0] = y.astype(o_ref.dtype)


def _pick_tile_l(L, block_l):
    """Largest multiple-of-128 divisor of L that is <= block_l (never just L
    when L is large), so the x double-buffer stays bounded and output stores
    stay unmasked lane-dense vst."""
    if L <= block_l:
        return L
    d = (block_l // 128) * 128
    while d >= 128:
        if L % d == 0:
            return d
        d -= 128
    # No multiple-of-128 divisor <= block_l: take the largest divisor <= block_l.
    for d in range(min(block_l, L), 0, -1):
        if L % d == 0:
            return d
    return L


def adaptor_forward(x, w1, b1, w2, b2, *, block_l=1024,
                    compute_dtype=jnp.bfloat16):
    """Pallas wrapper for the Adaptor forward.

    x : (B, C_in, L)          -- PyTorch Conv1d layout (channels second, L last)
    w1: (P, C_in), b1: (P,)   -- Conv1d(input_dim, num_patches, kernel_size=1)
    w2: (P, P),    b2: (P,)   -- Conv1d(num_patches, num_patches, kernel_size=1)

    compute_dtype: dtype of the MXU operands (x, w1, w2).  Default bf16 (half
    the HBM/VMEM traffic on this memory-bound kernel, fast MXU path on v5e).
    Pass None to keep the input dtype.  Accumulation / bias / ReLU stay f32.
    """
    B, C_in, L = x.shape
    P = w1.shape[0]

    if compute_dtype is not None:
        xc = x.astype(compute_dtype)
        w1c = w1.astype(compute_dtype)
        w2c = w2.astype(compute_dtype)
    else:
        xc, w1c, w2c = x, w1, w2

    # Biases as (P, 1) columns so they broadcast over the lane (L) axis in-kernel.
    b1c = b1.astype(jnp.float32).reshape(P, 1)
    b2c = b2.astype(jnp.float32).reshape(P, 1)

    # Tile the spatial axis: largest multiple-of-128 divisor of L <= block_l.
    tl = _pick_tile_l(L, block_l)
    # Keep >= 2 parallel grid steps when possible (both v7x TensorCores get work).
    if B == 1 and L // tl == 1 and tl % 256 == 0:
        tl //= 2
    grid = (B, L // tl)

    # Explicit scoped-VMEM budget: double-buffered x + double-buffered out +
    # resident weights/biases, with headroom for compiler-internal scratch.
    x_buf = C_in * tl * xc.dtype.itemsize
    o_buf = P * tl * x.dtype.itemsize
    w_buf = (P * C_in + P * P) * w1c.dtype.itemsize + 2 * P * 4
    needed = 2 * x_buf + 2 * o_buf + w_buf
    vmem_limit = min(max(int(needed * 1.5) + (4 << 20), 16 << 20), 56 << 20)

    # Advisory cost estimate so XLA schedules/overlaps the custom call correctly.
    flops = 2 * B * L * (P * C_in + P * P)
    bytes_accessed = (B * C_in * L * xc.dtype.itemsize
                      + (P * C_in + P * P) * w1c.dtype.itemsize
                      + 2 * P * 4
                      + B * P * L * x.dtype.itemsize)
    cost = pl.CostEstimate(flops=flops, transcendentals=0,
                           bytes_accessed=bytes_accessed)

    return pl.pallas_call(
        adaptor_kernel,
        out_shape=jax.ShapeDtypeStruct((B, P, L), x.dtype),
        grid_spec=pltpu.PrefetchScalarGridSpec(
            num_scalar_prefetch=0,
            grid=grid,
            in_specs=[
                # Streaming x tile.  (If profiling shows exposed DMA at small
                # tiles, add pipeline_mode=pl.Buffered(3) here — costs one more
                # C_in*tl buffer of VMEM, so skip on v7x with large tl.)
                pl.BlockSpec((1, C_in, tl), lambda b, l: (b, 0, l)),
                pl.BlockSpec((P, C_in), lambda b, l: (0, 0)),  # constant blocks ->
                pl.BlockSpec((P, 1), lambda b, l: (0, 0)),     # weights/biases DMA'd
                pl.BlockSpec((P, P), lambda b, l: (0, 0)),     # once, stay resident
                pl.BlockSpec((P, 1), lambda b, l: (0, 0)),
            ],
            out_specs=pl.BlockSpec((1, P, tl), lambda b, l: (b, 0, l)),
        ),
        compiler_params=pltpu.CompilerParams(
            dimension_semantics=("parallel", "parallel"),
            vmem_limit_bytes=vmem_limit),
        cost_estimate=cost,
    )(xc, w1c, b1c, w2c, b2c)


def adaptor_reference(x, w1, b1, w2, b2):
    """Pure-JAX f32 reference mirroring the PyTorch forward (conv1d k=1 + ReLU, x2)."""
    h = jnp.einsum('oi,bil->bol', w1, x) + b1[None, :, None]
    h = jnp.maximum(h, 0.0)
    y = jnp.einsum('oi,bil->bol', w2, h) + b2[None, :, None]
    return jnp.maximum(y, 0.0)


if __name__ == "__main__":
    # Small shapes consistent with the module (scaled down from
    # input_dim=75*40=3000, num_patches=64): B=2, C_in=256, P=64, L=128.
    B, C_in, P, L = 2, 256, 64, 128

    key = jax.random.PRNGKey(0)
    kx, kw1, kb1, kw2, kb2 = jax.random.split(key, 5)

    x = jax.random.normal(kx, (B, C_in, L), dtype=jnp.float32)
    w1 = 0.02 * jax.random.normal(kw1, (P, C_in), dtype=jnp.float32)
    b1 = 0.02 * jax.random.normal(kb1, (P,), dtype=jnp.float32)
    w2 = 0.02 * jax.random.normal(kw2, (P, P), dtype=jnp.float32)
    b2 = 0.02 * jax.random.normal(kb2, (P,), dtype=jnp.float32)

    ref = adaptor_reference(x, w1, b1, w2, b2)

    # Default (production) path: bf16 MXU operands, f32 accumulation.
    out_bf16 = adaptor_forward(x, w1, b1, w2, b2)
    out_bf16 = jax.block_until_ready(out_bf16)
    assert out_bf16.shape == (B, P, L)
    assert jnp.allclose(out_bf16, ref, rtol=2e-2, atol=2e-2), \
        "bf16-path mismatch vs reference"

    # f32 path (exact check of the kernel structure).
    out_f32 = adaptor_forward(x, w1, b1, w2, b2, compute_dtype=None)
    out_f32 = jax.block_until_ready(out_f32)
    assert jnp.allclose(out_f32, ref, rtol=1e-4, atol=1e-5), \
        "f32-path mismatch vs reference"

    print("KERNEL_OK")
</pallas_src>

<mosaic_0001>
module attributes {stable_mosaic.version = 11 : i64} {
  func.func @adaptor_kernel(%arg0: i32, %arg1: i32, %arg2: memref<1x256x128xbf16, #tpu.memory_space<vmem>>, %arg3: memref<64x256xbf16, #tpu.memory_space<vmem>>, %arg4: memref<64x1xf32, #tpu.memory_space<vmem>>, %arg5: memref<64x64xbf16, #tpu.memory_space<vmem>>, %arg6: memref<64x1xf32, #tpu.memory_space<vmem>>, %arg7: memref<1x64x128xf32, #tpu.memory_space<vmem>>) attributes {dimension_semantics = [#tpu.dimension_semantics<parallel>, #tpu.dimension_semantics<parallel>], iteration_bounds = array<i64: 2, 1>, scalar_prefetch = 0 : i64, scratch_operands = 0 : i64, tpu.core_type = #tpu.core_type<tc>, window_params = [{transform_indices = @transform_0, window_bounds = array<i64: 1, 256, 128>}, {pipeline_mode = #tpu.pipeline_mode<synchronous>, transform_indices = @transform_1, window_bounds = array<i64: 64, 256>}, {pipeline_mode = #tpu.pipeline_mode<synchronous>, transform_indices = @transform_2, window_bounds = array<i64: 64, 1>}, {pipeline_mode = #tpu.pipeline_mode<synchronous>, transform_indices = @transform_3, window_bounds = array<i64: 64, 64>}, {pipeline_mode = #tpu.pipeline_mode<synchronous>, transform_indices = @transform_4, window_bounds = array<i64: 64, 1>}, {transform_indices = @transform_5, window_bounds = array<i64: 1, 64, 128>}]} {
    %c0 = arith.constant 0 : index
    %c0_0 = arith.constant 0 : index
    %c0_1 = arith.constant 0 : index
    %0 = vector.load %arg2[%c0, %c0_0, %c0_1] : memref<1x256x128xbf16, #tpu.memory_space<vmem>>, vector<1x256x128xbf16>
    %1 = vector.shape_cast %0 : vector<1x256x128xbf16> to vector<256x128xbf16>
    %c0_2 = arith.constant 0 : index
    %c0_3 = arith.constant 0 : index
    %2 = vector.load %arg3[%c0_2, %c0_3] : memref<64x256xbf16, #tpu.memory_space<vmem>>, vector<64x256xbf16>
    %cst = arith.constant dense<0.000000e+00> : vector<64x128xf32>
    %3 = tpu.matmul %2, %1, %cst {dimension_numbers = #tpu.dot_dimension_numbers<[1], [0], [0], [1], [0, 0, 1, 1], [], []>} : vector<64x256xbf16>, vector<256x128xbf16>, vector<64x128xf32> -> vector<64x128xf32>
    %c0_4 = arith.constant 0 : index
    %c0_5 = arith.constant 0 : index
    %4 = vector.load %arg4[%c0_4, %c0_5] : memref<64x1xf32, #tpu.memory_space<vmem>>, vector<64x1xf32>
    %5 = vector.broadcast %4 : vector<64x1xf32> to vector<64x128xf32>
    %6 = arith.addf %3, %5 : vector<64x128xf32>
    %cst_6 = arith.constant 0.000000e+00 : f32
    %7 = vector.broadcast %cst_6 : f32 to vector<64x128xf32>
    %8 = arith.maximumf %6, %7 : vector<64x128xf32>
    %c0_7 = arith.constant 0 : index
    %c0_8 = arith.constant 0 : index
    %9 = vector.load %arg5[%c0_7, %c0_8] : memref<64x64xbf16, #tpu.memory_space<vmem>>, vector<64x64xbf16>
    %10 = arith.truncf %8 : vector<64x128xf32> to vector<64x128xbf16>
    %cst_9 = arith.constant dense<0.000000e+00> : vector<64x128xf32>
    %11 = tpu.matmul %9, %10, %cst_9 {dimension_numbers = #tpu.dot_dimension_numbers<[1], [0], [0], [1], [0, 0, 1, 1], [], []>} : vector<64x64xbf16>, vector<64x128xbf16>, vector<64x128xf32> -> vector<64x128xf32>
    %c0_10 = arith.constant 0 : index
    %c0_11 = arith.constant 0 : index
    %12 = vector.load %arg6[%c0_10, %c0_11] : memref<64x1xf32, #tpu.memory_space<vmem>>, vector<64x1xf32>
    %13 = vector.broadcast %12 : vector<64x1xf32> to vector<64x128xf32>
    %14 = arith.addf %11, %13 : vector<64x128xf32>
    %cst_12 = arith.constant 0.000000e+00 : f32
    %15 = vector.broadcast %cst_12 : f32 to vector<64x128xf32>
    %16 = arith.maximumf %14, %15 : vector<64x128xf32>
    %c0_13 = arith.constant 0 : index
    %c0_14 = arith.constant 0 : index
    %c0_15 = arith.constant 0 : index
    %17 = vector.load %arg7[%c0_13, %c0_14, %c0_15] : memref<1x64x128xf32, #tpu.memory_space<vmem>>, vector<1x64x128xf32>
    %18 = vector.shape_cast %17 : vector<1x64x128xf32> to vector<64x128xf32>
    %19 = vector.shape_cast %16 : vector<64x128xf32> to vector<1x64x128xf32>
    tpu.vector_store %arg7[%c0_13, %c0_14, %c0_15], %19 {strides = array<i32>} : memref<1x64x128xf32, #tpu.memory_space<vmem>>, vector<1x64x128xf32>,
    return
  }
  func.func @transform_0(%arg0: i32, %arg1: i32) -> (i32, i32, i32) {
    %c0_i32 = arith.constant 0 : i32
    %c0_i32_0 = arith.constant 0 : i32
    return %arg0, %c0_i32, %arg1 : i32, i32, i32
  }
  func.func @transform_1(%arg0: i32, %arg1: i32) -> (i32, i32) {
    %c0_i32 = arith.constant 0 : i32
    %c0_i32_0 = arith.constant 0 : i32
    %c0_i32_1 = arith.constant 0 : i32
    return %c0_i32, %c0_i32_0 : i32, i32
  }
  func.func @transform_2(%arg0: i32, %arg1: i32) -> (i32, i32) {
    %c0_i32 = arith.constant 0 : i32
    %c0_i32_0 = arith.constant 0 : i32
    %c0_i32_1 = arith.constant 0 : i32
    return %c0_i32, %c0_i32_0 : i32, i32
  }
  func.func @transform_3(%arg0: i32, %arg1: i32) -> (i32, i32) {
    %c0_i32 = arith.constant 0 : i32
    %c0_i32_0 = arith.constant 0 : i32
    %c0_i32_1 = arith.constant 0 : i32
    return %c0_i32, %c0_i32_0 : i32, i32
  }
  func.func @transform_4(%arg0: i32, %arg1: i32) -> (i32, i32) {
    %c0_i32 = arith.constant 0 : i32
    %c0_i32_0 = arith.constant 0 : i32
    %c0_i32_1 = arith.constant 0 : i32
    return %c0_i32, %c0_i32_0 : i32, i32
  }
  func.func @transform_5(%arg0: i32, %arg1: i32) -> (i32, i32, i32) {
    %c0_i32 = arith.constant 0 : i32
    %c0_i32_0 = arith.constant 0 : i32
    return %arg0, %c0_i32, %arg1 : i32, i32, i32
  }
}

</mosaic_0001>

<bundles_post_ra>
// kernel: tpu_custom_call.1
= control target key start
LH: loop header
LB: loop body
LE: loop exit
PB: predicated region body
PF: predicated region fallthrough
CT: control target
= control target key end

     0   :  { %10 = vsyncpa [#allocation3], 0  ;;  %s1479_s0 = inlined_call_operand.hbm [shape: bf16[2,256,128], index: 0, kind: input, shape index: {}]   ;;  %s1480_s1 = inlined_call_operand.vmem [shape: bf16[64,256], index: 1, kind: input, shape index: {}]   ;;  %s1481_s2 = inlined_call_operand.vmem [shape: f32[64,1], index: 2, kind: input, shape index: {}]   ;;  %s1482_s3 = inlined_call_operand.vmem [shape: bf16[64,64], index: 3, kind: input, shape index: {}]   ;;  %s1483_s4 = inlined_call_operand.vmem [shape: f32[64,1], index: 4, kind: input, shape index: {}]   ;;  %s1484_s5 = inlined_call_operand.hbm [shape: f32[2,64,128], index: 5, kind: output, shape index: {}]  }
   0x1   :  { %12 = vsyncpa [#allocation3 + $0x1], 0 }
   0x2   :  { %13 = vsyncpa [#allocation4], 0 }
   0x3   :  { %15 = vsyncpa [#allocation4 + $0x1], 0  ;;  %s1197_s18 = smov 0   ;;  %s1199_s19 = smov 0  }
   0x4   :  { %s1201_s20 = smov 0   ;;  %s1203_s21 = smov 0  }
   0x5   :  { %s1205_s22 = smov 0   ;;  %s1207_s23 = smov 0  }
   0x6 LB: > { %s832_s24 = sadd.s32 4294967295, %s1158_s23   ;;  %s833_s25 = sadd.s32 4294967294, %s1158_s23   ;;  %s1158_s23 = sphi %s1207_s23, %s21_s23   ;;  %s1154_s22 = sphi %s1205_s22, %s1499_s22   ;;  %s1150_s21 = sphi %s1203_s21, %s1498_s21   ;;  %s1146_s20 = sphi %s1201_s20, %s1497_s20   ;;  %s1142_s19 = sphi %s1199_s19, %s1496_s19   ;;  %s1138_s18 = sphi %s1197_s18, %s1495_s18  }
   0x7   : > { %s33_s26 = sadd.s32 1, %s1154_s22  ;;  %s42_s27 = sadd.s32 1, %s1146_s20 }
   0x8   : > { %p35_p0 = scmp.ge.s32.totalorder %s33_s26, 2  ;;  %p49_p1 = scmp.ne.s32.totalorder %s1146_s20, %s1142_s19 }
   0x9   : > { %p50_p2 = scmp.eq.s32.totalorder %s1158_s23, 0  ;;  %p55_p3 = scmp.ne.s32.totalorder %s1142_s19, %s1138_s18 }
   0xa   : > { %s1501_s26 = smov (%p35_p0, %s33_s26), 0  ;;  %p56_p5 = scmp.eq.s32.totalorder %s832_s24, 0 }
   0xb   : > { %p1238_p4 = por %p50_p2, %p49_p1  ;;  %s37_s29 = ssub.s32 %s1154_s22, %s1501_s26 }
   0xc   : > { %p165_p6 = scmp.eq.s32.totalorder %s832_s24, 1  ;;  %p40_p7 = scmp.eq.s32.totalorder %s37_s29, 0 }
   0xd   : > { %p1244_p8 = por %p56_p5, %p55_p3  ;;  %p171_p10 = scmp.eq.s32.totalorder %s833_s25, 1 }
   0xe   : > { %p1248_p9 = por %p165_p6, %p49_p1  ;;  %p957_p13 = scmp.lt.s32.totalorder %s1158_s23, 2 }
   0xf   : > { %s1253_s7 = scalar_select %p40_p7, %s1146_s20, %s42_s27  }
  0x10   : > { %s1488_s6 = scalar_select %p1248_p9, 1, 0 }
  0x11   : > { %p1255_p11 = por %p171_p10, %p55_p3  ;;  %s203_s9 = sand.u32 1, %s1146_s20  }
  0x12   : > { %s836_s10 = sshll.u32 %s203_s9, 7  ;;  %s879_s11 = sshll.u32 %s1154_s22, 11 }
  0x13   : > { %s1489_s8 = scalar_select %p1255_p11, 1, 0 }
  0x14   : > { %s1266_s14 = scalar_lea.hbm %s1479_s0, %s879_s11  ;;  %s207_s15 = scalar_lea.vmem [#allocation2], %s836_s10 }
  0x15   : > { %s215_s16 = sshll.u32 %s207_s15, 4  ;;  %p1272_p0 = pnand %p957_p13, %p1238_p4  ;;  %s1268_s16 = int_to_ptr.vmem [resolvable:$true] %s215_s16 }
  0x16   : > { %s1277_s24 = scalar_lea.sflag [#allocation3], %s203_s9  ;;  %s1046_s25 = scalar_lea.hbm %s1266_s14, 2048 }
  0x17   : > { %p1047_p2 = scmp.ne.s32.totalorder %s1266_s14, %s1046_s25  ;;  %p1048_p3 = pneg %p1272_p0 }
  0x18   : > { %s1051_s28 = scalar_lea.hbm %s1479_s0, 4096  ;;  %p1052_p4 = scmp.lt.u32.totalorder %s1266_s14, %s1479_s0 }
  0x19   : > { %p1049_p5 = pnand %p1048_p3, %p1047_p2  ;;  %p1053_p7 = scmp.lt.u32.totalorder %s1051_s28, %s1046_s25 }
  0x1a   : > { %p1055_p13 = scmp.lt.u32.totalorder %s1046_s25, %s1266_s14 }
  0x1b   : > { %p1050_p6 = pneg %p1049_p5  ;;  %p1054_p10 = por %p1053_p7, %p1052_p4 }
  0x1d   : > { %p1056_p12 = por %p1055_p13, %p1054_p10 }
  0x1f   : > { %p1057_p1 = pnand %p1056_p12, %p1050_p6 }
  0x21   : > { %1060 = shalt.err (!%p1057_p1)
}
  0x22   : > { %s1061_s9 = scalar_lea.vmem %s1268_s16, 2048  ;;  %s1160_s12 = smov [#allocation2]  }
  0x23   : > { %p1062_p2 = scmp.ne.s32.totalorder %s1268_s16, %s1061_s9  ;;  %s1066_s13 = sshll.u32 %s1160_s12, 4  ;;  %s1067_s13 = int_to_ptr.vmem [resolvable:$false] %s1066_s13 }
  0x24   : > { %s1068_s15 = scalar_lea.vmem %s1067_s13, 4096  ;;  %p1069_p9 = scmp.lt.s32.totalorder %s1268_s16, %s1067_s13 }
  0x25   : > { %p1064_p5 = pnand %p1062_p2, %p1048_p3  ;;  %p1070_p4 = scmp.lt.s32.totalorder %s1068_s15, %s1061_s9 }
  0x27   : > { %p1065_p11 = pneg %p1064_p5  ;;  %p1071_p7 = por %p1070_p4, %p1069_p9 }
  0x29   : > { %p1072_p10 = pnand %p1071_p7, %p1065_p11 }
  0x2b   : > { %1075 = shalt.err (!%p1072_p10)
}
  0x2c   : > { %s1161_s25 = smov 64   ;;  %s1162_s27 = smov 4  }
  0x2d   : > { %952 = dma.hbm_to_vmem [thread:$0]  (!%p1272_p0), %s1266_s14, 2048, %s1268_s16, %s1277_s24, %s1161_s25, %s1161_s25, %s1162_s27  }
  0x2e   : > { %p223_p12 = scmp.lt.s32.totalorder %s1158_s23, 3  ;;  %p1491_p1 = scmp.ge.s32.totalorder %s1158_s23, 1 }
  0x30   : > { %p224_p3 = pnand %p1491_p1, %p223_p12 }
  0x31   : > { %s1309_s29 = sand.u32 (!%p224_p3), 1, %s1142_s19  }
  0x32   : > { %227 = sbr.rel (%p224_p3) target bundleno = 585 (0x249), region = 40  ;;  %s840_s28 = sshll.u32 (!%p224_p3), %s1309_s29, 7 }
  0x33   : > { %s230_s10 = scalar_lea.sflag (!%p224_p3), [#allocation3], %s1309_s29  ;;  %s1313_s11 = scalar_lea.vmem (!%p224_p3), [#allocation2], %s840_s28 }
  0x39   : > { %1129 = dma.done.wait (%p1244_p8), %s230_s10, 2048  }
  0x3a   : > { %1131 = vsyncadd (%p1244_p8), %s230_s10, 4294965248  ;;  %v1163_v0 = vmov 0   ;;  %v1014_v1 = vld [vmem:[%s1313_s11 + $0x40] sm:$0xff]   ;;  %v1016_v3 = vld [vmem:[%s1313_s11 + $0x48] sm:$0xff]   ;;  %vm638_vm0 = vcmask 523264   ;;  %s841_s14 = sshll.u32 %s1309_s29, 6 }
  0x3b   : > { %1012 = vset.pattern.permute.xlu0 %v1163_v0  ;;  %1013 = vset.pattern.permute.xlu1 %v1163_v0  ;;  %v1015_v2 = vld [vmem:[%s1313_s11] sm:$0xff]   ;;  %v1017_v4 = vld [vmem:[%s1313_s11 + $0x8] sm:$0xff]   ;;  %v1018_v5 = vld [vmem:[%s1313_s11 + $0x50] sm:$0xff]   ;;  %s259_s16 = scalar_lea.vmem [#allocation5], %s841_s14  ;;  %s880_s17 = sshll.u32 %s1150_s21, 10 }
  0x3c   : > { %881 = vmatprep.subr.bf16.mxu0 %v1014_v1  ;;  %v1019_v6 = vld [vmem:[%s1313_s11 + $0x10] sm:$0xff]   ;;  %v1020_v7 = vld [vmem:[%s1313_s11 + $0x58] sm:$0xff]   ;;  %v1022_v9 = vld [vmem:[%s1313_s11 + $0x60] sm:$0xff]   ;;  %s1430_s12 = scalar_lea.hbm %s1484_s5, %s880_s17  ;;  %s733_s21 = scalar_lea.sflag [#allocation4], %s1309_s29 }
  0x3d   : > { %882 = vmatpush3.bf16.msra.mxu0 %v1015_v2  ;;  %v1021_v8 = vld [vmem:[%s1313_s11 + $0x18] sm:$0xff]   ;;  %v1023_v10 = vld [vmem:[%s1313_s11 + $0x20] sm:$0xff]   ;;  %v1024_v11 = vld [vmem:[%s1313_s11 + $0x68] sm:$0xff]   ;;  %p1492_p9 = scmp.ne.s32.totalorder %s1488_s6, 0  ;;  %s1164_s15 = smov [#allocation5]  }
  0x3e   : > { %883 = vmatprep.subr.bf16.mxu0 %v1016_v3  ;;  %v1032_v12 = vld [vmem:[%s1480_s1 + $0x4] ss:$8 sps:$4 sm:$0xff]   ;;  %v1026_v14 = vld [vmem:[%s1313_s11 + $0x70] sm:$0xff]   ;;  %v304_v19 = vld [vmem:[%s1481_s2 + $0x18] sm:$0xff]  ;;  %s1080_s25 = sshll.u32 %s1164_s15, 4  ;;  %s1081_s25 = int_to_ptr.vmem [resolvable:$false] %s1080_s25 }
  0x3f   : > { %v1025_v13 = vld [vmem:[%s1313_s11 + $0x28] sm:$0xff]   ;;  %517 = vmatprep.mubr.bf16.mxu0 %v1032_v12  ;;  %v301_v15 = vld [vmem:[%s1481_s2] sm:$0xff]  ;;  %v303_v16 = vld [vmem:[%s1481_s2 + $0x10] sm:$0xff]  ;;  %s1082_s27 = scalar_lea.vmem %s1081_s25, 2048 }
  0x40   : > { %311 = vperm.xlu0 %1012, %v301_v15   ;;  %321 = vperm.xlu1 %1013, %v303_v16   ;;  %v1027_v17 = vld [vmem:[%s1313_s11 + $0x30] sm:$0xff]   ;;  %v302_v18 = vld [vmem:[%s1481_s2 + $0x8] sm:$0xff]  ;;  %v1028_v20 = vld [vmem:[%s1313_s11 + $0x78] sm:$0xff]  }
  0x41   : > { %884 = vmatpush3.bf16.msra.mxu0 %v1017_v4  ;;  %v1029_v21 = vld [vmem:[%s1313_s11 + $0x38] sm:$0xff]   ;;  %v305_v22 = vld [vmem:[%s1481_s2 + $0x20] sm:$0xff]  ;;  %v306_v23 = vld [vmem:[%s1481_s2 + $0x28] sm:$0xff]  ;;  %s747_s11 = sshll.u32 %s259_s16, 4  ;;  %s1425_s11 = int_to_ptr.vmem [resolvable:$true] %s747_s11 }
  0x42   : > { %885 = vmatprep.subr.bf16.mxu0 %v1018_v5  ;;  %v1030_v24 = vld [vmem:[%s1480_s1] ss:$8 sps:$4 sm:$0xff]   ;;  %v1033_v25 = vld [vmem:[%s1480_s1 + $0x14] ss:$8 sps:$4 sm:$0xff]   ;;  %v1035_v30 = vld [vmem:[%s1480_s1 + $0x10] ss:$8 sps:$4 sm:$0xff]   ;;  %p1083_p6 = scmp.lt.s32.totalorder %s1425_s11, %s1081_s25 }
  0x43   : > { %v307_v26 = vld [vmem:[%s1481_s2 + $0x30] sm:$0xff]  ;;  %v308_v27 = vld [vmem:[%s1481_s2 + $0x38] sm:$0xff]  ;;  %v570_v28 = vld [vmem:[%s1483_s4] sm:$0xff]  ;;  %s1076_s13 = scalar_lea.vmem %s1425_s11, 1024 }
  0x44   : > { %316 = vperm.xlu0 %1012, %v302_v18   ;;  %326 = vperm.xlu1 %1013, %v304_v19   ;;  %v571_v29 = vld [vmem:[%s1483_s4 + $0x8] sm:$0xff]  ;;  %v572_v32 = vld [vmem:[%s1483_s4 + $0x10] sm:$0xff]  ;;  %v573_v33 = vld [vmem:[%s1483_s4 + $0x18] sm:$0xff]  ;;  %p1077_p8 = scmp.ne.s32.totalorder %s1425_s11, %s1076_s13  ;;  %p1084_p13 = scmp.lt.s32.totalorder %s1082_s27, %s1076_s13 }
  0x45   : > { %886 = vmatpush3.bf16.msra.mxu0 %v1019_v6  ;;  %v1036_v31 = vld [vmem:[%s1480_s1 + $0x24] ss:$8 sps:$4 sm:$0xff]   ;;  %v1038_v36 = vld [vmem:[%s1480_s1 + $0x20] ss:$8 sps:$4 sm:$0xff]   ;;  %v1039_v37 = vld [vmem:[%s1480_s1 + $0x34] ss:$8 sps:$4 sm:$0xff]  }
  0x46   : > { %887 = vmatprep.subr.bf16.mxu0 %v1020_v7  ;;  %v574_v34 = vld [vmem:[%s1483_s4 + $0x20] sm:$0xff]  ;;  %v575_v35 = vld [vmem:[%s1483_s4 + $0x28] sm:$0xff]  ;;  %v576_v38 = vld [vmem:[%s1483_s4 + $0x30] sm:$0xff]  ;;  %p1078_p11 = pnand %p1077_p8, %p1492_p9  ;;  %p1085_p2 = por %p1084_p13, %p1083_p6 }
  0x47   : > { %v577_v39 = vld [vmem:[%s1483_s4 + $0x38] sm:$0xff]  ;;  %v1042_v41 = vld [vmem:[%s1482_s3] sm:$0xff]  }
  0x48   : > { %331 = vperm.xlu0 %1012, %v305_v22   ;;  %336 = vperm.xlu1 %1013, %v306_v23   ;;  %v1041_v40 = vld [vmem:[%s1480_s1 + $0x30] ss:$8 sps:$4 sm:$0xff]   ;;  %p1079_p0 = pneg %p1078_p11 }
  0x49   : > { %888 = vmatpush3.bf16.msra.mxu0 %v1021_v8  ;;  %937 = vmatprep.mubr.msk.bf16.mxu1 %vm638_vm0, %v1042_v41 }
  0x4a   : > { %889 = vmatprep.subr.bf16.mxu0 %v1022_v9  ;;  %p1086_p5 = pnand %p1085_p2, %p1079_p0 }
  0x4c   : > { %341 = vperm.xlu0 %1012, %v307_v26   ;;  %346 = vperm.xlu1 %1013, %v308_v27  }
  0x4d   : > { %890 = vmatpush3.bf16.msra.mxu0 %v1023_v10 }
  0x4e   : > { %891 = vmatprep.subr.bf16.mxu0 %v1024_v11 }
  0x50   : > { %580 = vperm.xlu0 %1012, %v570_v28   ;;  %585 = vperm.xlu1 %1013, %v571_v29  }
  0x51   : > { %892 = vmatpush3.bf16.msra.mxu0 %v1025_v13 }
  0x52   : > { %893 = vmatprep.subr.bf16.mxu0 %v1026_v14 }
  0x54   : > { %590 = vperm.xlu0 %1012, %v572_v32   ;;  %595 = vperm.xlu1 %1013, %v573_v33   ;;  %v1045_v32 = vld [vmem:[%s1482_s3 + $0x18] sm:$0xff]  }
  0x55   : > { %894 = vmatpush3.bf16.msra.mxu0 %v1027_v17 }
  0x56   : > { %895 = vmatprep.subr.bf16.mxu0 %v1028_v20 }
  0x58   : > { %600 = vperm.xlu0 %1012, %v574_v34   ;;  %605 = vperm.xlu1 %1013, %v575_v35  }
  0x59   : > { %896 = vmatpush3.bf16.msra.mxu0 %v1029_v21 }
  0x5c   : > { %518 = vmatmul.mubr.bf16.vlgmr.msra.gmra.mrb[0].mxu0 %v1030_v24  ;;  %610 = vperm.xlu0 %1012, %v576_v38  }
  0x5d   : > { %525 = vmatprep.mubr.bf16.mxu0 %v1033_v25  ;;  %615 = vperm.xlu1 %1013, %v577_v39  }
  0x64   : > { %526 = vmatmul.mubr.bf16.gmra.mrb[4].mxu0 %v1035_v30  ;;  %v1043_v30 = vld [vmem:[%s1482_s3 + $0x8] sm:$0xff]  }
  0x65   : > { %533 = vmatprep.mubr.bf16.mxu0 %v1036_v31  ;;  %v1044_v31 = vld [vmem:[%s1482_s3 + $0x10] sm:$0xff]  }
  0x6c   : > { %534 = vmatmul.mubr.bf16.gmra.mrb[8].mxu0 %v1038_v36 }
  0x6d   : > { %541 = vmatprep.mubr.bf16.mxu0 %v1039_v37 }
  0x74   : > { %542 = vmatmul.mubr.bf16.gmra.mrb[12].mxu0 %v1041_v40 }
  0xbf   : > { %v312_v42 = vpop.permute.xlu0 %311  ;;  %v322_v52 = vpop.permute.xlu1 %321 }
  0xc3   : > { %v317_v50 = vpop.permute.xlu0 %316  ;;  %v327_v63 = vpop.permute.xlu1 %326 }
  0xc7   : > { %v332_v8 = vpop.permute.xlu0 %331  ;;  %v337_v12 = vpop.permute.xlu1 %336 }
  0xcb   : > { %v342_v21 = vpop.permute.xlu0 %341  ;;  %v347_v25 = vpop.permute.xlu1 %346 }
  0xcf   : > { %v581_v33 = vpop.permute.xlu0 %580  ;;  %v586_v34 = vpop.permute.xlu1 %585 }
  0xd3   : > { %v591_v35 = vpop.permute.xlu0 %590  ;;  %v596_v36 = vpop.permute.xlu1 %595 }
  0xd7   : > { %v601_v40 = vpop.permute.xlu0 %600 }
 0x12f   : > { %v897_v43 = vpop.f32.mrb[0].mxu0 }
 0x130   : > { %v898_v44 = vpop.f32.mrb[1].mxu0 }
 0x131   : > { %v899_v45 = vadd.f32 %v898_v44, %v897_v43  ;;  %v900_v46 = vpop.f32.mrb[2].mxu0 }
 0x132   : > { %v901_v47 = vpop.f32.mrb[3].mxu0 }
 0x133   : > { %v520_v48 = vadd.f32 %v899_v45, %v312_v42  ;;  %v902_v49 = vadd.f32 %v901_v47, %v900_v46  ;;  %v606_v46 = vpop.permute.xlu1 %605 }
 0x135   : > { %v523_v51 = vadd.f32 %v902_v49, %v317_v50  ;;  %v550_v53 = vmax.f32 %v520_v48, 0.0 }
 0x137   : > { %v551_v54 = vmax.f32 %v523_v51, 0.0  ;;  %v903_v55 = vpop.f32.mrb[4].mxu0  ;;  %v611_v51 = vpop.permute.xlu0 %610 }
 0x138   : > { %v904_v56 = vpop.f32.mrb[5].mxu0 }
 0x139   : > { %v905_v57 = vadd.f32 %v904_v56, %v903_v55  ;;  %v906_v58 = vpop.f32.mrb[6].mxu0  ;;  %v566_v59 = vpack.c.bf16 %v551_v54, %v550_v53  ;;  %v616_v55 = vpop.permute.xlu1 %615 }
 0x13a   : > { %v907_v60 = vpop.f32.mrb[7].mxu0 }
 0x13b   : > { %v528_v61 = vadd.f32 %v905_v57, %v322_v52  ;;  %v908_v62 = vadd.f32 %v907_v60, %v906_v58  ;;  %929 = vmatprep.subr.bf16.mxu1 %v566_v59 }
 0x13c   : > { %930 = vmatpush3.bf16.msra.mxu1 %v566_v59 }
 0x13d   : > { %v531_v0 = vadd.f32 %v908_v62, %v327_v63  ;;  %v552_v1 = vmax.f32 %v528_v61, 0.0 }
 0x13f   : > { %v553_v2 = vmax.f32 %v531_v0, 0.0  ;;  %v909_v3 = vpop.f32.mrb[8].mxu0 }
 0x140   : > { %v910_v4 = vpop.f32.mrb[9].mxu0 }
 0x141   : > { %v911_v5 = vadd.f32 %v910_v4, %v909_v3  ;;  %v912_v6 = vpop.f32.mrb[10].mxu0  ;;  %v567_v7 = vpack.c.bf16 %v553_v2, %v552_v1 }
 0x142   : > { %v913_v9 = vpop.f32.mrb[11].mxu0 }
 0x143   : > { %v536_v10 = vadd.f32 %v911_v5, %v332_v8  ;;  %v914_v11 = vadd.f32 %v913_v9, %v912_v6  ;;  %931 = vmatprep.subr.bf16.mxu1 %v567_v7 }
 0x144   : > { %932 = vmatpush3.bf16.msra.mxu1 %v567_v7 }
 0x145   : > { %v539_v13 = vadd.f32 %v914_v11, %v337_v12  ;;  %v554_v14 = vmax.f32 %v536_v10, 0.0 }
 0x147   : > { %v555_v15 = vmax.f32 %v539_v13, 0.0  ;;  %v915_v16 = vpop.f32.mrb[12].mxu0 }
 0x148   : > { %v916_v17 = vpop.f32.mrb[13].mxu0 }
 0x149   : > { %v917_v18 = vadd.f32 %v916_v17, %v915_v16  ;;  %v918_v19 = vpop.f32.mrb[14].mxu0  ;;  %v568_v20 = vpack.c.bf16 %v555_v15, %v554_v14 }
 0x14a   : > { %v919_v22 = vpop.f32.mrb[15].mxu0 }
 0x14b   : > { %v544_v23 = vadd.f32 %v917_v18, %v342_v21  ;;  %v920_v24 = vadd.f32 %v919_v22, %v918_v19  ;;  %933 = vmatprep.subr.bf16.mxu1 %v568_v20 }
 0x14c   : > { %934 = vmatpush3.bf16.msra.mxu1 %v568_v20 }
 0x14d   : > { %v547_v26 = vadd.f32 %v920_v24, %v347_v25  ;;  %v556_v27 = vmax.f32 %v544_v23, 0.0 }
 0x14f   : > { %v557_v28 = vmax.f32 %v547_v26, 0.0 }
 0x151   : > { %v569_v29 = vpack.c.bf16 %v557_v28, %v556_v27 }
 0x153   : > { %935 = vmatprep.subr.bf16.mxu1 %v569_v29 }
 0x154   : > { %936 = vmatpush3.bf16.msra.mxu1 %v569_v29 }
 0x157   : > { %938 = vmatmul.mubr.msk.bf16.vlgmr.msra.gmra.mrb[0].mxu1 %vm638_vm0, %v1043_v30 }
 0x158   : > { %941 = vmatprep.mubr.msk.bf16.mxu1 %vm638_vm0, %v1044_v31 }
 0x15f   : > { %942 = vmatmul.mubr.msk.bf16.gmra.mrb[4].mxu1 %vm638_vm0, %v1045_v32 }
 0x22a   : > { %v939_v37 = vpop.f32.mrb[0].mxu1 }
 0x22b   : > { %v694_v38 = vadd.f32 %v939_v37, %v591_v35  ;;  %v685_v39 = vpop.f32.mrb[1].mxu1 }
 0x22c   : > { %v686_v41 = vadd.f32 %v685_v39, %v581_v33  ;;  %v940_v42 = vpop.f32.mrb[2].mxu1 }
 0x22d   : > { %v718_v43 = vmax.f32 %v694_v38, 0.0  ;;  %v697_v44 = vadd.f32 %v940_v42, %v596_v36  ;;  %v688_v45 = vpop.f32.mrb[3].mxu1 }
 0x22e   : > { %v716_v47 = vmax.f32 %v686_v41, 0.0  ;;  %v689_v48 = vadd.f32 %v688_v45, %v586_v34 }
 0x22f   : > { %726 = vst [vmem:[%s259_s16 + $0x10] sm:$0xff] %v718_v43  ;;  %v719_v49 = vmax.f32 %v697_v44, 0.0 }
 0x230   : > { %724 = vst [vmem:[%s259_s16] sm:$0xff] %v716_v47  ;;  %v717_v50 = vmax.f32 %v689_v48, 0.0 }
 0x231   : > { %727 = vst [vmem:[%s259_s16 + $0x18] sm:$0xff] %v719_v49 }
 0x232   : > { %725 = vst [vmem:[%s259_s16 + $0x8] sm:$0xff] %v717_v50  ;;  %v943_v52 = vpop.f32.mrb[4].mxu1 }
 0x233   : > { %v710_v53 = vadd.f32 %v943_v52, %v611_v51  ;;  %v701_v54 = vpop.f32.mrb[5].mxu1 }
 0x234   : > { %v702_v56 = vadd.f32 %v701_v54, %v601_v40  ;;  %v944_v57 = vpop.f32.mrb[6].mxu1 }
 0x235   : > { %v722_v58 = vmax.f32 %v710_v53, 0.0  ;;  %v713_v59 = vadd.f32 %v944_v57, %v616_v55  ;;  %v704_v60 = vpop.f32.mrb[7].mxu1 }
 0x236   : > { %v720_v61 = vmax.f32 %v702_v56, 0.0  ;;  %v705_v62 = vadd.f32 %v704_v60, %v606_v46 }
 0x237   : > { %730 = vst [vmem:[%s259_s16 + $0x30] sm:$0xff] %v722_v58  ;;  %v723_v63 = vmax.f32 %v713_v59, 0.0 }
 0x238   : > { %728 = vst [vmem:[%s259_s16 + $0x20] sm:$0xff] %v720_v61  ;;  %v721_v0 = vmax.f32 %v705_v62, 0.0 }
 0x239   : > { %731 = vst [vmem:[%s259_s16 + $0x38] sm:$0xff] %v723_v63 }
 0x23a   : > { %729 = vst [vmem:[%s259_s16 + $0x28] sm:$0xff] %v721_v0 }
 0x23b   : > { %1089 = shalt.err (!%p1086_p5)
}
 0x23c   : > { %s1090_s28 = scalar_lea.hbm %s1430_s12, 1024  ;;  %s1094_s14 = scalar_lea.hbm %s1484_s5, 2048 }
 0x23d   : > { %p1091_p4 = scmp.ne.s32.totalorder %s1430_s12, %s1090_s28  ;;  %p1095_p12 = scmp.lt.u32.totalorder %s1430_s12, %s1484_s5 }
 0x23e   : > { %p1096_p1 = scmp.lt.u32.totalorder %s1094_s14, %s1090_s28  ;;  %p1098_p8 = scmp.lt.u32.totalorder %s1090_s28, %s1430_s12 }
 0x23f   : > { %p1092_p7 = pnand %p1091_p4, %p1492_p9 }
 0x240   : > { %p1097_p3 = por %p1096_p1, %p1095_p12 }
 0x241   : > { %p1093_p10 = pneg %p1092_p7 }
 0x242   : > { %p1099_p11 = por %p1098_p8, %p1097_p3 }
 0x244   : > { %p1100_p0 = pnand %p1099_p11, %p1093_p10 }
 0x246   : > { %1103 = shalt.err (!%p1100_p0)
}
 0x247   : > { %s1165_s24 = smov 128   ;;  %s1166_s9 = smov 8  }
 0x248   : > { %947 = dma.vmem_to_hbm [thread:$0]  (%p1492_p9), %s1425_s11, 1024, %s1430_s12, %s733_s21, %s1165_s24, %s1165_s24, %s1166_s9  }
 0x249 PF: > { %s762_s13 = sand.u32 1, %s1138_s18   ;;  %p1493_p6 = scmp.ne.s32.totalorder %s1489_s8, 0 }
 0x24a   : > { %p1494_p13 = scmp.ge.s32.totalorder %s1158_s23, 2  ;;  %s763_s15 = scalar_lea.sflag [#allocation4], %s762_s13 }
 0x24c   : > { %p954_p2 = pnand %p1494_p13, %p1493_p6 }
 0x24e   : > { %1133 = dma.done.wait (!%p954_p2), %s763_s15, 1024  }
 0x24f   : > { %1135 = vsyncadd (!%p954_p2), %s763_s15, 4294966272  ;;  %s21_s23 = sadd.s32 1, %s1158_s23   ;;  %s1495_s18 = smov %s1142_s19 }
 0x250   : > { %p18_p5 = scmp.ge.s32.totalorder %s21_s23, 4   ;;  %s1496_s19 = smov %s1146_s20 }
 0x251   : > { %s1497_s20 = smov %s1253_s7  ;;  %s1498_s21 = smov %s1154_s22 }
 0x252   : > { %s1499_s22 = smov %s1501_s26  ;;  %20 = sbr.rel (!%p18_p5) target bundleno = 6 (0x6), region = 85 }
 0x259   :  { %768 = vsyncpa [#allocation3], 1 }
 0x25a   :  { %770 = vsyncpa [#allocation3 + $0x1], 1 }
 0x25b   :  { %771 = vsyncpa [#allocation4], 1 }
 0x25c   :  { %773 = vsyncpa [#allocation4 + $0x1], 1 }

</bundles_post_ra>
